<compile_context>
chip_gen: v5e
topology: v5e:2x2
jax: 0.10.0
libtpu: 0.0.40
codegen_flags: <defaults>
</compile_context>

<pallas_src>
import functools

import jax
import jax.numpy as jnp
from jax import lax
from jax.experimental import pallas as pl
from jax.experimental.pallas import tpu as pltpu


_TM_MAX = 512    # row tile (sublane axis of the input block); 512*2048*4B = 4 MiB/buffer
_TK_MAX = 2048   # spatial (lane) tile; H*W larger than this gets a reduction grid axis


def _gap_kernel_single(x_ref, o_ref, *, inv_hw):
    # x_ref: (tm, HW) block; o_ref: (tm, 1) per-row means.
    x = x_ref[...].astype(jnp.float32)
    s = jnp.sum(x, axis=-1, keepdims=True)          # per-sublane reduce over the lane axis
    o_ref[...] = (s * inv_hw).astype(o_ref.dtype)


def _gap_kernel_split(x_ref, o_ref, acc_ref, *, inv_hw, hw, tk):
    # Grid = (row_tiles, hw_tiles); the spatial axis is the (innermost) reduction axis.
    k = pl.program_id(1)

    @pl.when(k == 0)
    def _():
        acc_ref[...] = jnp.zeros_like(acc_ref)

    x = x_ref[...].astype(jnp.float32)
    if hw % tk != 0:
        # Ragged tail tile: zero out columns past the true spatial extent.
        col = lax.broadcasted_iota(jnp.int32, x.shape, 1) + k * tk
        x = jnp.where(col < hw, x, 0.0)
    acc_ref[...] += jnp.sum(x, axis=-1, keepdims=True)

    @pl.when(k == pl.num_programs(1) - 1)
    def _():
        o_ref[...] = (acc_ref[...] * inv_hw).astype(o_ref.dtype)


def global_avg_pool2d(x):
    """x: (N, C, H, W) -> (N, C); matches F.avg_pool2d(x, (H, W)).view(N, C)."""
    N, C, H, W = x.shape
    R = N * C
    HW = H * W
    inv_hw = 1.0 / float(HW)
    out_dtype = x.dtype

    # Free, contiguous view: one row per (n, c), spatial axis on the 128-lane axis.
    x2 = x.reshape(R, HW)

    # Row tile: whole R when small (block == full dim, no alignment constraint),
    # otherwise 512 (multiple of 8 sublanes). A ragged trailing row tile is safe since
    # every output row depends only on its own input row and OOB stores are masked.
    tm = R if R <= _TM_MAX else _TM_MAX
    grid_rows = pl.cdiv(R, tm)

    cost = pl.CostEstimate(
        flops=R * HW,
        transcendentals=0,
        bytes_accessed=R * HW * x.dtype.itemsize + R * jnp.dtype(out_dtype).itemsize,
    )

    if HW <= _TK_MAX:
        # Single pass over the spatial axis per row tile (no accumulator needed).
        y = pl.pallas_call(
            functools.partial(_gap_kernel_single, inv_hw=inv_hw),
            out_shape=jax.ShapeDtypeStruct((R, 1), out_dtype),
            grid_spec=pltpu.PrefetchScalarGridSpec(
                num_scalar_prefetch=0,
                grid=(grid_rows,),
                in_specs=[pl.BlockSpec((tm, HW), lambda i: (i, 0))],
                out_specs=pl.BlockSpec((tm, 1), lambda i: (i, 0)),
            ),
            compiler_params=pltpu.CompilerParams(
                dimension_semantics=("parallel",),
            ),
            cost_estimate=cost,
        )(x2)
    else:
        # Large spatial extent: tile H*W on a reduction grid axis + f32 VMEM accumulator.
        tk = _TK_MAX
        grid_k = pl.cdiv(HW, tk)
        y = pl.pallas_call(
            functools.partial(_gap_kernel_split, inv_hw=inv_hw, hw=HW, tk=tk),
            out_shape=jax.ShapeDtypeStruct((R, 1), out_dtype),
            grid_spec=pltpu.PrefetchScalarGridSpec(
                num_scalar_prefetch=0,
                grid=(grid_rows, grid_k),
                in_specs=[pl.BlockSpec((tm, tk), lambda i, k: (i, k))],
                out_specs=pl.BlockSpec((tm, 1), lambda i, k: (i, 0)),
                scratch_shapes=[pltpu.VMEM((tm, 1), jnp.float32)],
            ),
            compiler_params=pltpu.CompilerParams(
                dimension_semantics=("parallel", "arbitrary"),
            ),
            cost_estimate=cost,
        )(x2)

    # Note: output is kept (N*C, 1) sublane-major (the standard per-row-scalar pattern,
    # e.g. flash-attn LSE) rather than a flat lane-dense (N*C,) slab; output bytes are
    # negligible vs. input traffic and this avoids an in-kernel cross-layout relayout.
    return y.reshape(N, C)


if __name__ == "__main__":
    key = jax.random.PRNGKey(0)

    # Primary small case (exercises the single-pass path).
    N, C, H, W = 2, 4, 16, 16
    x = jax.random.normal(key, (N, C, H, W), dtype=jnp.float32)
    y = jax.block_until_ready(global_avg_pool2d(x))
    y_ref = jnp.mean(x, axis=(2, 3))
    assert y.shape == (N, C), y.shape
    assert jnp.allclose(y, y_ref, atol=1e-5, rtol=1e-5), (y, y_ref)

    # Secondary case with H*W > _TK_MAX (exercises the accumulator / masked-tail path).
    N2, C2, H2, W2 = 2, 4, 48, 48
    x2 = jax.random.normal(jax.random.PRNGKey(1), (N2, C2, H2, W2), dtype=jnp.float32)
    y2 = jax.block_until_ready(global_avg_pool2d(x2))
    y2_ref = jnp.mean(x2, axis=(2, 3))
    assert y2.shape == (N2, C2), y2.shape
    assert jnp.allclose(y2, y2_ref, atol=1e-5, rtol=1e-5), (y2, y2_ref)

    print("KERNEL_OK")
</pallas_src>

<mosaic_0001>
module attributes {stable_mosaic.version = 11 : i64} {
  func.func @_gap_kernel_single(%arg0: i32, %arg1: memref<8x256xf32, #tpu.memory_space<vmem>>, %arg2: memref<8x1xf32, #tpu.memory_space<vmem>>) attributes {dimension_semantics = [#tpu.dimension_semantics<parallel>], iteration_bounds = array<i64: 1>, scalar_prefetch = 0 : i64, scratch_operands = 0 : i64, tpu.core_type = #tpu.core_type<tc>, window_params = [{transform_indices = @transform_0, window_bounds = array<i64: 8, 256>}, {transform_indices = @transform_1, window_bounds = array<i64: 8, 1>}]} {
    %c0 = arith.constant 0 : index
    %c0_0 = arith.constant 0 : index
    %0 = vector.load %arg1[%c0, %c0_0] : memref<8x256xf32, #tpu.memory_space<vmem>>, vector<8x256xf32>
    %cst = arith.constant dense<0.000000e+00> : vector<8xf32>
    %1 = vector.multi_reduction <add>, %0, %cst [1] : vector<8x256xf32> to vector<8xf32>
    %2 = vector.shape_cast %1 : vector<8xf32> to vector<8x1xf32>
    %cst_1 = arith.constant 3.906250e-03 : f32
    %3 = vector.broadcast %cst_1 : f32 to vector<8x1xf32>
    %4 = arith.mulf %2, %3 : vector<8x1xf32>
    %c0_2 = arith.constant 0 : index
    %c0_3 = arith.constant 0 : index
    %5 = vector.load %arg2[%c0_2, %c0_3] : memref<8x1xf32, #tpu.memory_space<vmem>>, vector<8x1xf32>
    tpu.vector_store %arg2[%c0_2, %c0_3], %4 {strides = array<i32>} : memref<8x1xf32, #tpu.memory_space<vmem>>, vector<8x1xf32>,
    return
  }
  func.func @transform_0(%arg0: i32) -> (i32, i32) {
    %c0_i32 = arith.constant 0 : i32
    %c0_i32_0 = arith.constant 0 : i32
    return %arg0, %c0_i32 : i32, i32
  }
  func.func @transform_1(%arg0: i32) -> (i32, i32) {
    %c0_i32 = arith.constant 0 : i32
    %c0_i32_0 = arith.constant 0 : i32
    return %arg0, %c0_i32 : i32, i32
  }
}

</mosaic_0001>

<bundles_post_ra>
// kernel: tpu_custom_call.1
= control target key start
LH: loop header
LB: loop body
LE: loop exit
PB: predicated region body
PF: predicated region fallthrough
CT: control target
= control target key end

     0   :  { %6 = vsyncpa [#allocation3], 0  ;;  %s62_s9 = smov [#allocation2]   ;;  %s79_s0 = inlined_call_operand.hbm [shape: f32[8,256], index: 0, kind: input, shape index: {}]   ;;  %s80_s1 = inlined_call_operand.vmem [shape: f32[8,1], index: 1, kind: output, shape index: {}]  }
   0x1   :  { %s12_s8 = sshll.u32 %s79_s0, 4  ;;  %s14_s10 = sshll.u32 %s62_s9, 4  ;;  %s13_s8 = int_to_ptr.hbm [resolvable:$true] %s12_s8  ;;  %s15_s10 = int_to_ptr.vmem [resolvable:$true] %s14_s10 }
   0x2   :  { %17 = dma.hbm_to_vmem [thread:$0]  %s13_s8, 256, %s15_s10, [#allocation3]  }
   0x3   :  { %60 = dma.done.wait [#allocation3], 256  }
   0x4   :  { %61 = vsyncadd [#allocation3], 4294967040  ;;  %v22_v0 = vld [vmem:[#allocation2] sm:$0xff]  ;;  %v23_v1 = vld [vmem:[#allocation2 + $0x8] sm:$0xff]  ;;  %vm28_vm0 = vcmask 7168  }
   0x5   :  { %v24_v2 = vadd.f32 %v23_v1, %v22_v0 }
   0x7   :  { %25 = vadd.xlane.f32.xlu0 %v24_v2 }
  0x7a   :  { %v26_v3 = vpop.xlane.xlu0 %25 }
  0x7b   :  { %v27_v4 = vmul.f32 0.00390625, %v26_v3 }
  0x7d   :  { %29 = vst.msk [vmem:[%s80_s1] sm:$0xff] %vm28_vm0, %v27_v4 }
  0x7e   :  { %34 = vsyncpa [#allocation3], 1 }

</bundles_post_ra>
